<compile_context>
chip_gen: v5e
topology: v5e:2x2
jax: 0.10.0
libtpu: 0.0.40
codegen_flags: <defaults>
</compile_context>

<pallas_src>
import math

import jax
import jax.numpy as jnp
from jax.experimental import pallas as pl
from jax.experimental.pallas import tpu as pltpu


# ----------------------------------------------------------------------------
# Tile selection helpers
# ----------------------------------------------------------------------------

def _sublane_multiple(dtype):
    """Second-minor block dims must be a multiple of this (or the full dim)."""
    return {4: 8, 2: 16, 1: 32}.get(jnp.dtype(dtype).itemsize, 8)


def _pick_tile(dim, candidates, prefer_two_blocks=False):
    """Largest candidate dividing `dim` (optionally leaving >=2 grid blocks),
    else the full dim (full-extent blocks are always layout-legal)."""
    divisors = [c for c in candidates if dim % c == 0]
    if prefer_two_blocks:
        for c in divisors:
            if dim // c >= 2:
                return c
    if divisors:
        return divisors[0]
    return dim


# ----------------------------------------------------------------------------
# Kernels
# ----------------------------------------------------------------------------

def _fused_groups_kernel(x_ref, w_ref, b_ref, o_ref):
    """All groups in one step.  x:(G,tn,K) w:(G,K,M) b:(G,M) o:(G,tn,M).

    Weight/bias blocks have constant indices -> resident in VMEM; no K axis,
    no accumulator, single batched dot on the MXU, one store per N tile."""
    acc = jnp.einsum("gnk,gkm->gnm", x_ref[...], w_ref[...],
                     preferred_element_type=jnp.float32)
    acc = acc + b_ref[...].astype(jnp.float32)[:, None, :]
    o_ref[...] = acc.astype(o_ref.dtype)


def _group_mm_bias_kernel(x_ref, w_ref, b_ref, o_ref):
    """Per-group matmul, K in a single step (no accumulator scratch).
    x:(tn,K) w:(K,tm) b:(1,tm) o:(tn,tm)."""
    acc = jnp.dot(x_ref[...], w_ref[...], preferred_element_type=jnp.float32)
    o_ref[...] = (acc + b_ref[...].astype(jnp.float32)).astype(o_ref.dtype)


def _group_mm_bias_acc_kernel(x_ref, w_ref, b_ref, o_ref, acc_ref):
    """Per-group matmul with K tiled (last grid axis) and f32 accumulator.
    x:(tn,tk) w:(tk,tm) b:(1,tm) o:(tn,tm) acc:(tn,tm)f32."""
    @pl.when(pl.program_id(3) == 0)
    def _():
        acc_ref[...] = jnp.zeros_like(acc_ref)

    acc_ref[...] += jnp.dot(x_ref[...], w_ref[...],
                            preferred_element_type=jnp.float32)

    @pl.when(pl.program_id(3) == pl.num_programs(3) - 1)
    def _():
        o_ref[...] = (acc_ref[...] + b_ref[...].astype(jnp.float32)).astype(o_ref.dtype)


# ----------------------------------------------------------------------------
# Wrappers
# ----------------------------------------------------------------------------

_VMEM_LIMIT = 48 * 1024 * 1024          # safe on v5e/v6e (128 MiB) and v7x (64 MiB)
_FUSED_RESIDENT_BUDGET = 16 << 20       # 2x-buffered weight+bias slab cap (bytes)
_FUSED_TILE_BUDGET = 16 << 20           # 2x-buffered x/out N-tiles cap (bytes)


def _cost(G, N, K, M, itemsize):
    return pl.CostEstimate(
        flops=2 * G * N * K * M,                     # true FLOPs (no slab inflation)
        transcendentals=0,
        bytes_accessed=itemsize * (G * N * K + G * K * M + G * N * M + G * M),
    )


def _forward_fused(x, weight, bias):
    """Resident-weight path for small per-group dims: tile only N."""
    G, N, K = x.shape
    M = weight.shape[2]
    dtype = x.dtype
    isz = jnp.dtype(dtype).itemsize
    sub = _sublane_multiple(dtype)

    # N tile: largest sublane-aligned candidate whose double-buffered x/out
    # tiles fit the budget; prefer >=2 grid blocks so both v7x TCs get work.
    cands = [c for c in (1024, 512, 256, 128, 64, 32, 16, 8)
             if c % sub == 0 and 2 * c * G * (K + M) * isz <= _FUSED_TILE_BUDGET]
    tn = _pick_tile(N, cands, prefer_two_blocks=True)
    grid = (N // tn,)

    return pl.pallas_call(
        _fused_groups_kernel,
        out_shape=jax.ShapeDtypeStruct((G, N, M), dtype),
        grid_spec=pltpu.PrefetchScalarGridSpec(
            num_scalar_prefetch=0,
            grid=grid,
            in_specs=[
                pl.BlockSpec((G, tn, K), lambda i: (0, i, 0)),   # x N-tile
                pl.BlockSpec((G, K, M), lambda i: (0, 0, 0)),    # weight: resident
                pl.BlockSpec((G, M), lambda i: (0, 0)),          # bias:   resident
            ],
            out_specs=pl.BlockSpec((G, tn, M), lambda i: (0, i, 0)),
        ),
        compiler_params=pltpu.CompilerParams(
            dimension_semantics=("parallel",),
            vmem_limit_bytes=_VMEM_LIMIT,
        ),
        cost_estimate=_cost(G, N, K, M, isz),
    )(x, weight, bias)


def _forward_grouped(x, weight, bias):
    """Per-group matmuls tiled over N/M (and K when needed)."""
    G, N, K = x.shape
    M = weight.shape[2]
    dtype = x.dtype
    isz = jnp.dtype(dtype).itemsize
    sub = _sublane_multiple(dtype)

    tk = _pick_tile(K, (1024, 512, 256, 128))            # depth first
    tm = _pick_tile(M, (512, 256, 128))                  # lane-dense (mult of 128)
    tn_cands = [c for c in (512, 256, 128, 64, 32, 16, 8) if c % sub == 0]
    tn = _pick_tile(N, tn_cands, prefer_two_blocks=(G == 1))

    cost = _cost(G, N, K, M, isz)
    cparams_common = dict(vmem_limit_bytes=_VMEM_LIMIT)

    if tk == K:
        # K fits one step: no accumulator scratch, no K grid axis, no epilogue branch.
        grid = (G, N // tn, M // tm)
        return pl.pallas_call(
            _group_mm_bias_kernel,
            out_shape=jax.ShapeDtypeStruct((G, N, M), dtype),
            grid_spec=pltpu.PrefetchScalarGridSpec(
                num_scalar_prefetch=0,
                grid=grid,
                in_specs=[
                    pl.BlockSpec((None, tn, K), lambda g, i, j: (g, i, 0)),
                    pl.BlockSpec((None, K, tm), lambda g, i, j: (g, 0, j)),
                    pl.BlockSpec((1, tm), lambda g, i, j: (g, j)),
                ],
                out_specs=pl.BlockSpec((None, tn, tm), lambda g, i, j: (g, i, j)),
            ),
            compiler_params=pltpu.CompilerParams(
                dimension_semantics=("parallel", "parallel", "parallel"),
                **cparams_common,
            ),
            cost_estimate=cost,
        )(x, weight, bias)

    grid = (G, N // tn, M // tm, K // tk)
    return pl.pallas_call(
        _group_mm_bias_acc_kernel,
        out_shape=jax.ShapeDtypeStruct((G, N, M), dtype),
        grid_spec=pltpu.PrefetchScalarGridSpec(
            num_scalar_prefetch=0,
            grid=grid,
            in_specs=[
                pl.BlockSpec((None, tn, tk), lambda g, i, j, k: (g, i, k)),
                pl.BlockSpec((None, tk, tm), lambda g, i, j, k: (g, k, j)),
                pl.BlockSpec((1, tm), lambda g, i, j, k: (g, j)),
            ],
            out_specs=pl.BlockSpec((None, tn, tm), lambda g, i, j, k: (g, i, j)),
            scratch_shapes=[pltpu.VMEM((tn, tm), jnp.float32)],
        ),
        compiler_params=pltpu.CompilerParams(
            dimension_semantics=("parallel", "parallel", "parallel", "arbitrary"),
            **cparams_common,
        ),
        cost_estimate=cost,
    )(x, weight, bias)


@jax.jit
def locally_connected_forward(x, weight, bias=None):
    G, N, K = x.shape
    M = weight.shape[2]
    if bias is None:
        bias = jnp.zeros((G, M), dtype=x.dtype)

    isz = jnp.dtype(x.dtype).itemsize
    sub = _sublane_multiple(x.dtype)
    resident_bytes = 2 * G * (K * M + M) * isz            # weight+bias, 2x-buffered
    min_tile_bytes = 2 * sub * G * (K + M) * isz          # smallest legal x/out tiles

    # Small per-group dims (would underfill the MXU / produce lane-masked
    # stores per group in the tiled path) and the whole weight fits resident
    # in VMEM on every generation -> fused resident path.
    if ((K < 256 or M < 256)
            and resident_bytes <= _FUSED_RESIDENT_BUDGET
            and min_tile_bytes <= _FUSED_TILE_BUDGET):
        return _forward_fused(x, weight, bias)
    return _forward_grouped(x, weight, bias)


# ----------------------------------------------------------------------------
# Self-test
# ----------------------------------------------------------------------------

if __name__ == "__main__":
    key = jax.random.PRNGKey(0)
    keys = jax.random.split(key, 9)

    # ---- Config 1: module's small config (fused resident path) ----
    groups, in_features, out_features, N = 4, 128, 128, 8
    K, M = in_features // groups, out_features // groups

    weight = jax.random.normal(keys[0], (groups, K, M), dtype=jnp.float32)
    bound = 1.0 / math.sqrt(K)
    bias = jax.random.uniform(keys[1], (groups, M), dtype=jnp.float32,
                              minval=-bound, maxval=bound)
    x = jax.random.normal(keys[2], (groups, N, K), dtype=jnp.float32)

    out = jax.block_until_ready(locally_connected_forward(x, weight, bias))
    ref = jnp.einsum("gnk,gkm->gnm", x, weight,
                     precision=jax.lax.Precision.HIGHEST) + bias[:, None, :]
    assert out.shape == (groups, N, M)
    assert jnp.allclose(out, ref, atol=1e-4, rtol=1e-4), "fused path mismatch"

    # ---- Config 2: large per-group dims, K fits one step (grouped, no-acc) ----
    G2, N2, K2, M2 = 2, 64, 1024, 256
    w2 = jax.random.normal(keys[3], (G2, K2, M2), dtype=jnp.float32) * 0.05
    b2 = jax.random.uniform(keys[4], (G2, M2), dtype=jnp.float32,
                            minval=-0.1, maxval=0.1)
    x2 = jax.random.normal(keys[5], (G2, N2, K2), dtype=jnp.float32)

    out2 = jax.block_until_ready(locally_connected_forward(x2, w2, b2))
    ref2 = jnp.einsum("gnk,gkm->gnm", x2, w2,
                      precision=jax.lax.Precision.HIGHEST) + b2[:, None, :]
    assert out2.shape == (G2, N2, M2)
    assert jnp.allclose(out2, ref2, atol=2e-2, rtol=2e-2), "grouped (no-acc) mismatch"

    # ---- Config 3: K larger than one tile (grouped, accumulator path) ----
    G3, N3, K3, M3 = 2, 64, 2048, 256
    w3 = jax.random.normal(keys[6], (G3, K3, M3), dtype=jnp.float32) * 0.05
    b3 = jax.random.uniform(keys[7], (G3, M3), dtype=jnp.float32,
                            minval=-0.1, maxval=0.1)
    x3 = jax.random.normal(keys[8], (G3, N3, K3), dtype=jnp.float32)

    out3 = jax.block_until_ready(locally_connected_forward(x3, w3, b3))
    ref3 = jnp.einsum("gnk,gkm->gnm", x3, w3,
                      precision=jax.lax.Precision.HIGHEST) + b3[:, None, :]
    assert out3.shape == (G3, N3, M3)
    assert jnp.allclose(out3, ref3, atol=2e-2, rtol=2e-2), "grouped (acc) mismatch"

    print("KERNEL_OK")
</pallas_src>

<mosaic_0001>
module attributes {stable_mosaic.version = 11 : i64} {
  func.func @_fused_groups_kernel(%arg0: i32, %arg1: memref<4x8x32xf32, #tpu.memory_space<vmem>>, %arg2: memref<4x32x32xf32, #tpu.memory_space<vmem>>, %arg3: memref<4x32xf32, #tpu.memory_space<vmem>>, %arg4: memref<4x8x32xf32, #tpu.memory_space<vmem>>) attributes {dimension_semantics = [#tpu.dimension_semantics<parallel>], iteration_bounds = array<i64: 1>, scalar_prefetch = 0 : i64, scratch_operands = 0 : i64, tpu.core_type = #tpu.core_type<tc>, window_params = [{transform_indices = @transform_0, window_bounds = array<i64: 4, 8, 32>}, {pipeline_mode = #tpu.pipeline_mode<synchronous>, transform_indices = @transform_1, window_bounds = array<i64: 4, 32, 32>}, {pipeline_mode = #tpu.pipeline_mode<synchronous>, transform_indices = @transform_2, window_bounds = array<i64: 4, 32>}, {transform_indices = @transform_3, window_bounds = array<i64: 4, 8, 32>}]} {
    %c0 = arith.constant 0 : index
    %c0_0 = arith.constant 0 : index
    %c0_1 = arith.constant 0 : index
    %0 = vector.load %arg1[%c0, %c0_0, %c0_1] : memref<4x8x32xf32, #tpu.memory_space<vmem>>, vector<4x8x32xf32>
    %c0_2 = arith.constant 0 : index
    %c0_3 = arith.constant 0 : index
    %c0_4 = arith.constant 0 : index
    %1 = vector.load %arg2[%c0_2, %c0_3, %c0_4] : memref<4x32x32xf32, #tpu.memory_space<vmem>>, vector<4x32x32xf32>
    "tpu.trace_start"() <{level = 10 : i32, message = "gnk,gkm->gnm"}> : () -> ()
    %cst = arith.constant dense<0.000000e+00> : vector<4x8x32xf32>
    %2 = tpu.matmul %0, %1, %cst {dimension_numbers = #tpu.dot_dimension_numbers<[2], [1], [1], [2], [0, 0, 0, 1, 1, 2], [0], [0]>} : vector<4x8x32xf32>, vector<4x32x32xf32>, vector<4x8x32xf32> -> vector<4x8x32xf32>
    "tpu.trace_stop"() : () -> ()
    %c0_5 = arith.constant 0 : index
    %c0_6 = arith.constant 0 : index
    %3 = vector.load %arg3[%c0_5, %c0_6] : memref<4x32xf32, #tpu.memory_space<vmem>>, vector<4x32xf32>
    %4 = vector.shape_cast %3 : vector<4x32xf32> to vector<4x1x32xf32>
    %5 = vector.broadcast %4 : vector<4x1x32xf32> to vector<4x8x32xf32>
    %6 = arith.addf %2, %5 : vector<4x8x32xf32>
    %c0_7 = arith.constant 0 : index
    %c0_8 = arith.constant 0 : index
    %c0_9 = arith.constant 0 : index
    %7 = vector.load %arg4[%c0_7, %c0_8, %c0_9] : memref<4x8x32xf32, #tpu.memory_space<vmem>>, vector<4x8x32xf32>
    tpu.vector_store %arg4[%c0_7, %c0_8, %c0_9], %6 {strides = array<i32>} : memref<4x8x32xf32, #tpu.memory_space<vmem>>, vector<4x8x32xf32>,
    return
  }
  func.func @transform_0(%arg0: i32) -> (i32, i32, i32) {
    %c0_i32 = arith.constant 0 : i32
    %c0_i32_0 = arith.constant 0 : i32
    %c0_i32_1 = arith.constant 0 : i32
    return %c0_i32, %arg0, %c0_i32_0 : i32, i32, i32
  }
  func.func @transform_1(%arg0: i32) -> (i32, i32, i32) {
    %c0_i32 = arith.constant 0 : i32
    %c0_i32_0 = arith.constant 0 : i32
    %c0_i32_1 = arith.constant 0 : i32
    %c0_i32_2 = arith.constant 0 : i32
    return %c0_i32, %c0_i32_0, %c0_i32_1 : i32, i32, i32
  }
  func.func @transform_2(%arg0: i32) -> (i32, i32) {
    %c0_i32 = arith.constant 0 : i32
    %c0_i32_0 = arith.constant 0 : i32
    %c0_i32_1 = arith.constant 0 : i32
    return %c0_i32, %c0_i32_0 : i32, i32
  }
  func.func @transform_3(%arg0: i32) -> (i32, i32, i32) {
    %c0_i32 = arith.constant 0 : i32
    %c0_i32_0 = arith.constant 0 : i32
    %c0_i32_1 = arith.constant 0 : i32
    return %c0_i32, %arg0, %c0_i32_0 : i32, i32, i32
  }
}

</mosaic_0001>

<bundles_post_ra>
// kernel: locally_connected_forward.1
= control target key start
LH: loop header
LB: loop body
LE: loop exit
PB: predicated region body
PF: predicated region fallthrough
CT: control target
= control target key end

     0   :  { %8 = vsyncpa [#allocation3], 0  ;;  %s377_s0 = inlined_call_operand.hbm [shape: f32[4,8,32], index: 0, kind: input, shape index: {}]   ;;  %s378_s1 = inlined_call_operand.hbm [shape: f32[4,32,32], index: 1, kind: input, shape index: {}]   ;;  %s379_s2 = inlined_call_operand.hbm [shape: f32[4,32], index: 2, kind: input, shape index: {}]   ;;  %s380_s3 = inlined_call_operand.hbm [shape: f32[4,8,32], index: 3, kind: output, shape index: {}]  }
   0x1   :  { %9 = vsyncpa [#allocation6], 0 }
   0x2   :  { %10 = vsyncpa [#allocation4], 0  ;;  %s28_s14 = sshll.u32 %s378_s1, 4  ;;  %s322_s15 = smov [#allocation5]   ;;  %s29_s14 = int_to_ptr.hbm [resolvable:$true] %s28_s14 }
   0x3   :  { %s30_s16 = sshll.u32 %s322_s15, 4  ;;  %s15_s19 = sshll.u32 %s377_s0, 4  ;;  %s31_s16 = int_to_ptr.vmem [resolvable:$true] %s30_s16  ;;  %s16_s19 = int_to_ptr.hbm [resolvable:$true] %s15_s19 }
   0x4   :  { %s323_s20 = smov 128   ;;  %s324_s21 = smov 8  }
   0x5   :  { %36 = dma.hbm_to_vmem [thread:$0]  %s29_s14, 2048, %s31_s16, [#allocation6], %s323_s20, %s323_s20, %s324_s21  }
   0x6   :  { %s325_s22 = smov [#allocation2]   ;;  %s42_s1 = sshll.u32 %s379_s2, 4  ;;  %s43_s1 = int_to_ptr.hbm [resolvable:$true] %s42_s1 }
   0x7   :  { %s17_s23 = sshll.u32 %s325_s22, 4  ;;  %s326_s0 = smov [#allocation7]   ;;  %s18_s23 = int_to_ptr.vmem [resolvable:$true] %s17_s23 }
   0x8   :  { %23 = dma.hbm_to_vmem [thread:$0]  %s16_s19, 512, %s18_s23, [#allocation3], %s323_s20, %s323_s20, %s324_s21  }
   0x9   :  { %s44_s26 = sshll.u32 %s326_s0, 4  ;;  %s45_s26 = int_to_ptr.vmem [resolvable:$true] %s44_s26 }
   0xa   :  { %47 = dma.hbm_to_vmem [thread:$0]  %s43_s1, 64, %s45_s26, [#allocation6]  }
   0xb   :  { %316 = dma.done.wait [#allocation3], 512  }
   0xc   :  { %317 = vsyncadd [#allocation3], 4294966784 }
   0xd   :  { %318 = dma.done.wait [#allocation6], 2112  }
   0xe   :  { %319 = vsyncadd [#allocation6], 4294965184  ;;  %v75_v0 = vld [vmem:[#allocation5 + $0x58] sm:$0xff]  ;;  %v74_v2 = vld [vmem:[#allocation5 + $0x50] sm:$0xff]  ;;  %vm93_vm0 = vcmask 261120   ;;  %s327_s2 = smov [#allocation8]  }
   0xf   :  { %v79_v1 = vld [vmem:[#allocation5 + $0x78] sm:$0xff]  ;;  %155 = vmatpush.msra.mxu2 %v75_v0  ;;  %v78_v3 = vld [vmem:[#allocation5 + $0x70] sm:$0xff]  ;;  %v73_v4 = vld [vmem:[#allocation5 + $0x48] sm:$0xff]  ;;  %s194_s27 = sshll.u32 %s327_s2, 4  ;;  %s196_s30 = sshll.u32 %s380_s3, 4  ;;  %s195_s27 = int_to_ptr.vmem [resolvable:$true] %s194_s27  ;;  %s197_s30 = int_to_ptr.hbm [resolvable:$true] %s196_s30 }
  0x10   :  { %178 = vmatpush.msra.mxu3 %v79_v1  ;;  %v77_v5 = vld [vmem:[#allocation5 + $0x68] sm:$0xff]  ;;  %v67_v6 = vld [vmem:[#allocation5 + $0x18] sm:$0xff]  ;;  %v72_v8 = vld [vmem:[#allocation5 + $0x40] sm:$0xff] }
  0x11   :  { %v71_v7 = vld [vmem:[#allocation5 + $0x38] sm:$0xff]  ;;  %156 = vmatpush.msra.mxu2 %v74_v2  ;;  %109 = vmatpush.msra.mxu0 %v67_v6  ;;  %v76_v9 = vld [vmem:[#allocation5 + $0x60] sm:$0xff]  ;;  %v66_v10 = vld [vmem:[#allocation5 + $0x10] sm:$0xff] }
  0x12   :  { %179 = vmatpush.msra.mxu3 %v78_v3  ;;  %132 = vmatpush.msra.mxu1 %v71_v7  ;;  %v70_v11 = vld [vmem:[#allocation5 + $0x30] sm:$0xff]  ;;  %v63_v13 = vld [vmem:[#allocation2 + $0x18] sm:$0xff]  ;;  %v65_v14 = vld [vmem:[#allocation5 + $0x8] sm:$0xff] }
  0x13   :  { %157 = vmatpush.msra.mxu2 %v73_v4  ;;  %v62_v12 = vld [vmem:[#allocation2 + $0x10] sm:$0xff]  ;;  %110 = vmatpush.msra.mxu0 %v66_v10  ;;  %v69_v15 = vld [vmem:[#allocation5 + $0x28] sm:$0xff]  ;;  %v64_v16 = vld [vmem:[#allocation5] sm:$0xff] }
  0x14   :  { %180 = vmatpush.msra.mxu3 %v77_v5  ;;  %133 = vmatpush.msra.mxu1 %v70_v11  ;;  %v68_v17 = vld [vmem:[#allocation5 + $0x20] sm:$0xff]  ;;  %v61_v19 = vld [vmem:[#allocation2 + $0x8] sm:$0xff] }
  0x15   :  { %158 = vmatpush.msra.mxu2 %v72_v8  ;;  %111 = vmatpush.msra.mxu0 %v65_v14  ;;  %v60_v18 = vld [vmem:[#allocation2] sm:$0xff] }
  0x16   :  { %181 = vmatpush.msra.mxu3 %v76_v9  ;;  %212 = vmatmul.msk.f32.vlgmr.msra.gmra.mxu2 %vm93_vm0, %v62_v12  ;;  %v80_v20 = vld [vmem:[#allocation7] sm:$0xf] }
  0x17   :  { %213 = vmatmul.msk.f32.vlgmr.msra.gmra.mxu3 %vm93_vm0, %v63_v13  ;;  %134 = vmatpush.msra.mxu1 %v69_v15  ;;  %v82_v21 = vrot.slane %v80_v20, 1  ;;  %v83_v22 = vrot.slane %v80_v20, 2  ;;  %v84_v23 = vrot.slane %v80_v20, 3  ;;  %v85_v24 = vperm.slane %v80_v20, 0 }
  0x18   :  { %112 = vmatpush.msra.mxu0 %v64_v16 }
  0x19   :  { %135 = vmatpush.msra.mxu1 %v68_v17  ;;  %210 = vmatmul.msk.f32.vlgmr.msra.gmra.mxu0 %vm93_vm0, %v60_v18  ;;  %v86_v25 = vperm.slane %v82_v21, 0  ;;  %v87_v26 = vperm.slane %v83_v22, 0  ;;  %v88_v27 = vperm.slane %v84_v23, 0 }
  0x1a   :  { %211 = vmatmul.msk.f32.vlgmr.msra.gmra.mxu1 %vm93_vm0, %v61_v19 }
  0x96   :  { %v114_v28 = vpop.f32.mrf.mxu0 }
  0x97   :  { %v137_v29 = vpop.f32.mrf.mxu1  ;;  %v115_v30 = vadd.f32 %v114_v28, %v85_v24 }
  0x98   :  { %v138_v31 = vadd.f32 %v137_v29, %v86_v25 }
  0x99   :  { %v160_v32 = vpop.f32.mrf.mxu2  ;;  %186 = vst.msk [vmem:[#allocation8] sm:$0xff] %vm93_vm0, %v115_v30 }
  0x9a   :  { %v183_v33 = vpop.f32.mrf.mxu3  ;;  %v161_v34 = vadd.f32 %v160_v32, %v87_v26  ;;  %187 = vst.msk [vmem:[#allocation8 + $0x8] sm:$0xff] %vm93_vm0, %v138_v31 }
  0x9b   :  { %v184_v35 = vadd.f32 %v183_v33, %v88_v27 }
  0x9c   :  { %188 = vst.msk [vmem:[#allocation8 + $0x10] sm:$0xff] %vm93_vm0, %v161_v34 }
  0x9d   :  { %189 = vst.msk [vmem:[#allocation8 + $0x18] sm:$0xff] %vm93_vm0, %v184_v35 }
  0x9e   :  { %202 = dma.vmem_to_hbm [thread:$0]  %s195_s27, 512, %s197_s30, [#allocation4], %s323_s20, %s323_s20, %s324_s21  }
  0x9f   :  { %320 = dma.done.wait [#allocation4], 512  }
  0xa0   :  { %321 = vsyncadd [#allocation4], 4294966784 }
  0xa1   :  { %207 = vsyncpa [#allocation3], 1 }
  0xa2   :  { %208 = vsyncpa [#allocation6], 1 }
  0xa3   :  { %209 = vsyncpa [#allocation4], 1 }

</bundles_post_ra>
